<compile_context>
chip_gen: v7x
topology: tpu7x:2x2x1
jax: 0.10.0
libtpu: 0.0.40
codegen_flags: <defaults>
</compile_context>

<pallas_src>
import functools

import jax
import jax.numpy as jnp
from jax.experimental import pallas as pl
from jax.experimental.pallas import tpu as pltpu


def _round_up(a, m):
    return ((a + m - 1) // m) * m


def _cdiv(a, b):
    return (a + b - 1) // b


def _backproject_kernel(invk_ref, depth_ref, out_ref, *, th, tw, tc):
    # invk_ref : (B*9,)      f32 in SMEM (scalar prefetch)
    # depth_ref: (th, tw)    depth tile (batch/channel dims squeezed)
    # out_ref  : (4, th, tw) f32 output tile (batch dim squeezed)
    b = pl.program_id(0)
    i = pl.program_id(1)   # row-tile index
    j = pl.program_id(2)   # column-tile index

    # Pixel coordinates for one (tc, tw) compute chunk.  x is constant across
    # row-chunks; y only needs a scalar offset per chunk.  Hoisted (no
    # broadcast re-materialization inside the loop).
    lane = jax.lax.broadcasted_iota(jnp.int32, (tc, tw), 1)
    x = (j * tw + lane).astype(jnp.float32)                    # (tc, tw)
    sub = jax.lax.broadcasted_iota(jnp.int32, (tc, tw), 0)
    y0 = (i * th + sub).astype(jnp.float32)                    # (tc, tw)

    base = b * 9
    k00 = invk_ref[base + 0]
    k01 = invk_ref[base + 1]
    k02 = invk_ref[base + 2]
    k10 = invk_ref[base + 3]
    k11 = invk_ref[base + 4]
    k12 = invk_ref[base + 5]
    k20 = invk_ref[base + 6]
    k21 = invk_ref[base + 7]
    k22 = invk_ref[base + 8]

    ones_chunk = jnp.ones((tc, tw), jnp.float32)

    def body(c, carry):
        r0 = pl.multiple_of(c * tc, tc)
        d = depth_ref[pl.ds(r0, tc), :].astype(jnp.float32)    # (tc, tw)
        y = y0 + (c * tc).astype(jnp.float32)
        # cam_r = depth * (K[r,0]*x + K[r,1]*y + K[r,2]); dense (tc, tw) stores.
        out_ref[0, pl.ds(r0, tc), :] = d * (k00 * x + k01 * y + k02)
        out_ref[1, pl.ds(r0, tc), :] = d * (k10 * x + k11 * y + k12)
        out_ref[2, pl.ds(r0, tc), :] = d * (k20 * x + k21 * y + k22)
        out_ref[3, pl.ds(r0, tc), :] = ones_chunk
        return carry

    jax.lax.fori_loop(0, th // tc, body, 0)


_TARGET_BLOCK_ELEMS = 256 * 1024     # ~5 MB of HBM traffic per grid step
_MAX_TW = 512                        # lane-axis tile cap (keeps chunks ~4 vregs)


@functools.partial(jax.jit, static_argnames=("height", "width"))
def backproject_depth(depth, inv_K, *, height, width):
    """JAX/Pallas equivalent of BackprojectDepth.forward.

    depth : (B, 1, H, W) float (any float dtype; cast in-kernel)
    inv_K : (B, 4, 4)    float32
    returns (B, 4, H*W)  float32
    """
    B = depth.shape[0]
    H, W = height, width

    # Lane tile: full (padded) width up to _MAX_TW lanes.
    tw = min(_round_up(W, 128), _MAX_TW)
    # Inner compute chunk: ~4K elements per value keeps ~20 vregs live.
    tc = max(8, 4096 // tw)
    # Row tile: big enough to hit the per-step traffic target, no bigger than
    # needed to cover H (rounded to the chunk size; OOB rows are discarded).
    th_cover = _round_up(H, tc)
    th_target = _round_up(max(tc, _TARGET_BLOCK_ELEMS // tw), tc)
    th = min(th_cover, th_target)
    # Keep >=2 grid steps when possible so v7x's two TensorCores both get work.
    if B * _cdiv(H, th) * _cdiv(W, tw) < 2 and th > tc:
        th = max(tc, _round_up(_cdiv(H, 2), tc))

    grid = (B, _cdiv(H, th), _cdiv(W, tw))

    # inv_K[:3,:3], flattened to 1-D so its SMEM footprint is tiny.
    invk_flat = inv_K[:, :3, :3].astype(jnp.float32).reshape(B * 9)

    kernel = functools.partial(_backproject_kernel, th=th, tw=tw, tc=tc)

    out = pl.pallas_call(
        kernel,
        out_shape=jax.ShapeDtypeStruct((B, 4, H, W), jnp.float32),
        grid_spec=pltpu.PrefetchScalarGridSpec(
            num_scalar_prefetch=1,
            grid=grid,
            in_specs=[
                # depth tile for batch b: (th, tw) window of the (H, W) image.
                pl.BlockSpec((None, None, th, tw),
                             lambda b, i, j, invk: (b, 0, i, j)),
            ],
            out_specs=pl.BlockSpec((None, 4, th, tw),
                                   lambda b, i, j, invk: (b, 0, i, j)),
        ),
        compiler_params=pltpu.CompilerParams(
            dimension_semantics=("parallel", "parallel", "parallel"),
            vmem_limit_bytes=64 * 1024 * 1024,
        ),
    )(invk_flat, depth)

    # Contiguous reshape (no data movement).
    return out.reshape(B, 4, H * W)


def _reference(depth, inv_K, height, width):
    """Pure-JAX reference mirroring the PyTorch forward."""
    B = depth.shape[0]
    HW = height * width
    xs = jnp.tile(jnp.arange(width, dtype=jnp.float32), height)
    ys = jnp.repeat(jnp.arange(height, dtype=jnp.float32), width)
    pix = jnp.stack([xs, ys, jnp.ones((HW,), jnp.float32)], 0)               # (3, HW)
    pix = jnp.broadcast_to(pix[None], (B, 3, HW))
    cam = jnp.einsum("bij,bjn->bin", inv_K[:, :3, :3].astype(jnp.float32), pix)
    cam = depth.reshape(B, 1, HW).astype(jnp.float32) * cam
    ones = jnp.ones((B, 1, HW), jnp.float32)
    return jnp.concatenate([cam, ones], axis=1)


def _make_inputs(key, B, H, W):
    k_depth, k_k = jax.random.split(key)
    depth = jax.random.uniform(k_depth, (B, 1, H, W), jnp.float32,
                               minval=0.1, maxval=10.0)
    fx, fy, cx, cy = 0.58 * W, 1.92 * H, 0.5 * W, 0.5 * H
    K = jnp.array([[fx, 0., cx, 0.],
                   [0., fy, cy, 0.],
                   [0., 0., 1., 0.],
                   [0., 0., 0., 1.]], jnp.float32)
    inv_K = jnp.broadcast_to(jnp.linalg.inv(K)[None], (B, 4, 4))
    inv_K = inv_K + 0.001 * jax.random.normal(k_k, (B, 4, 4), jnp.float32)
    return depth, inv_K


if __name__ == "__main__":
    key = jax.random.PRNGKey(0)

    # main test: aligned spatial size
    B, H, W = 2, 16, 16
    depth, inv_K = _make_inputs(key, B, H, W)
    out = jax.block_until_ready(backproject_depth(depth, inv_K, height=H, width=W))
    ref = _reference(depth, inv_K, H, W)
    assert out.shape == (B, 4, H * W)
    assert jnp.allclose(out, ref, atol=1e-4, rtol=1e-4)

    # ragged test: H, W not multiples of the tile (exercises OOB-clipped blocks)
    B2, H2, W2 = 2, 10, 13
    depth2, inv_K2 = _make_inputs(jax.random.PRNGKey(1), B2, H2, W2)
    out2 = jax.block_until_ready(backproject_depth(depth2, inv_K2, height=H2, width=W2))
    ref2 = _reference(depth2, inv_K2, H2, W2)
    assert out2.shape == (B2, 4, H2 * W2)
    assert jnp.allclose(out2, ref2, atol=1e-4, rtol=1e-4)

    # multi-tile test: B=1 with several row tiles and a partial column tile
    B3, H3, W3 = 1, 40, 200
    depth3, inv_K3 = _make_inputs(jax.random.PRNGKey(2), B3, H3, W3)
    out3 = jax.block_until_ready(backproject_depth(depth3, inv_K3, height=H3, width=W3))
    ref3 = _reference(depth3, inv_K3, H3, W3)
    assert out3.shape == (B3, 4, H3 * W3)
    assert jnp.allclose(out3, ref3, atol=1e-4, rtol=1e-4)

    print("KERNEL_OK")
</pallas_src>

<mosaic_0001>
module attributes {stable_mosaic.version = 11 : i64} {
  func.func @_backproject_kernel(%arg0: i32, %arg1: i32, %arg2: i32, %arg3: memref<18xf32, #tpu.memory_space<smem>>, %arg4: memref<1x1x32x128xf32, #tpu.memory_space<vmem>>, %arg5: memref<1x4x32x128xf32, #tpu.memory_space<vmem>>) attributes {dimension_semantics = [#tpu.dimension_semantics<parallel>, #tpu.dimension_semantics<parallel>, #tpu.dimension_semantics<parallel>], iteration_bounds = array<i64: 2, 1, 1>, scalar_prefetch = 1 : i64, scratch_operands = 0 : i64, tpu.core_type = #tpu.core_type<tc>, window_params = [{transform_indices = @transform_0, window_bounds = array<i64: 1, 1, 32, 128>}, {transform_indices = @transform_1, window_bounds = array<i64: 1, 4, 32, 128>}]} {
    %0 = tpu.iota {dimensions = array<i32: 1>} : vector<32x128xi32>
    %c128_i32 = arith.constant 128 : i32
    %1 = arith.muli %arg2, %c128_i32 : i32
    %2 = vector.broadcast %1 : i32 to vector<32x128xi32>
    %3 = arith.addi %2, %0 : vector<32x128xi32>
    %4 = arith.sitofp %3 : vector<32x128xi32> to vector<32x128xf32>
    %5 = tpu.iota {dimensions = array<i32: 0>} : vector<32x128xi32>
    %c32_i32 = arith.constant 32 : i32
    %6 = arith.muli %arg1, %c32_i32 : i32
    %7 = vector.broadcast %6 : i32 to vector<32x128xi32>
    %8 = arith.addi %7, %5 : vector<32x128xi32>
    %9 = arith.sitofp %8 : vector<32x128xi32> to vector<32x128xf32>
    %c9_i32 = arith.constant 9 : i32
    %10 = arith.muli %arg0, %c9_i32 : i32
    %c0_i32 = arith.constant 0 : i32
    %11 = arith.addi %10, %c0_i32 : i32
    %12 = arith.index_cast %11 : i32 to index
    %13 = memref.load %arg3[%12] : memref<18xf32, #tpu.memory_space<smem>>
    %c1_i32 = arith.constant 1 : i32
    %14 = arith.addi %10, %c1_i32 : i32
    %15 = arith.index_cast %14 : i32 to index
    %16 = memref.load %arg3[%15] : memref<18xf32, #tpu.memory_space<smem>>
    %c2_i32 = arith.constant 2 : i32
    %17 = arith.addi %10, %c2_i32 : i32
    %18 = arith.index_cast %17 : i32 to index
    %19 = memref.load %arg3[%18] : memref<18xf32, #tpu.memory_space<smem>>
    %c3_i32 = arith.constant 3 : i32
    %20 = arith.addi %10, %c3_i32 : i32
    %21 = arith.index_cast %20 : i32 to index
    %22 = memref.load %arg3[%21] : memref<18xf32, #tpu.memory_space<smem>>
    %c4_i32 = arith.constant 4 : i32
    %23 = arith.addi %10, %c4_i32 : i32
    %24 = arith.index_cast %23 : i32 to index
    %25 = memref.load %arg3[%24] : memref<18xf32, #tpu.memory_space<smem>>
    %c5_i32 = arith.constant 5 : i32
    %26 = arith.addi %10, %c5_i32 : i32
    %27 = arith.index_cast %26 : i32 to index
    %28 = memref.load %arg3[%27] : memref<18xf32, #tpu.memory_space<smem>>
    %c6_i32 = arith.constant 6 : i32
    %29 = arith.addi %10, %c6_i32 : i32
    %30 = arith.index_cast %29 : i32 to index
    %31 = memref.load %arg3[%30] : memref<18xf32, #tpu.memory_space<smem>>
    %c7_i32 = arith.constant 7 : i32
    %32 = arith.addi %10, %c7_i32 : i32
    %33 = arith.index_cast %32 : i32 to index
    %34 = memref.load %arg3[%33] : memref<18xf32, #tpu.memory_space<smem>>
    %c8_i32 = arith.constant 8 : i32
    %35 = arith.addi %10, %c8_i32 : i32
    %36 = arith.index_cast %35 : i32 to index
    %37 = memref.load %arg3[%36] : memref<18xf32, #tpu.memory_space<smem>>
    %cst = arith.constant 1.000000e+00 : f32
    %38 = vector.broadcast %cst : f32 to vector<32x128xf32>
    %c0_i32_0 = arith.constant 0 : i32
    %c32_i32_1 = arith.constant 32 : i32
    %39 = arith.muli %c0_i32_0, %c32_i32_1 : i32
    %40 = tpu.assume_multiple %39, 32 : i32
    %c0 = arith.constant 0 : index
    %c0_2 = arith.constant 0 : index
    %41 = arith.index_cast %40 : i32 to index
    %c0_3 = arith.constant 0 : index
    %42 = vector.load %arg4[%c0, %c0_2, %41, %c0_3] : memref<1x1x32x128xf32, #tpu.memory_space<vmem>>, vector<1x1x32x128xf32>
    %43 = vector.shape_cast %42 : vector<1x1x32x128xf32> to vector<32x128xf32>
    %c32_i32_4 = arith.constant 32 : i32
    %44 = arith.muli %c0_i32_0, %c32_i32_4 : i32
    %45 = arith.sitofp %44 : i32 to f32
    %46 = vector.broadcast %45 : f32 to vector<32x128xf32>
    %47 = arith.addf %9, %46 : vector<32x128xf32>
    %48 = vector.broadcast %13 : f32 to vector<32x128xf32>
    %49 = arith.mulf %48, %4 : vector<32x128xf32>
    %50 = vector.broadcast %16 : f32 to vector<32x128xf32>
    %51 = arith.mulf %50, %47 : vector<32x128xf32>
    %52 = arith.addf %49, %51 : vector<32x128xf32>
    %53 = vector.broadcast %19 : f32 to vector<32x128xf32>
    %54 = arith.addf %52, %53 : vector<32x128xf32>
    %55 = arith.mulf %43, %54 : vector<32x128xf32>
    %c0_5 = arith.constant 0 : index
    %c0_6 = arith.constant 0 : index
    %56 = arith.index_cast %40 : i32 to index
    %c0_7 = arith.constant 0 : index
    %57 = vector.load %arg5[%c0_5, %c0_6, %56, %c0_7] : memref<1x4x32x128xf32, #tpu.memory_space<vmem>>, vector<1x1x32x128xf32>
    %58 = vector.shape_cast %57 : vector<1x1x32x128xf32> to vector<32x128xf32>
    %59 = vector.shape_cast %55 : vector<32x128xf32> to vector<1x1x32x128xf32>
    tpu.vector_store %arg5[%c0_5, %c0_6, %56, %c0_7], %59 {strides = array<i32>} : memref<1x4x32x128xf32, #tpu.memory_space<vmem>>, vector<1x1x32x128xf32>,
    %60 = vector.broadcast %22 : f32 to vector<32x128xf32>
    %61 = arith.mulf %60, %4 : vector<32x128xf32>
    %62 = vector.broadcast %25 : f32 to vector<32x128xf32>
    %63 = arith.mulf %62, %47 : vector<32x128xf32>
    %64 = arith.addf %61, %63 : vector<32x128xf32>
    %65 = vector.broadcast %28 : f32 to vector<32x128xf32>
    %66 = arith.addf %64, %65 : vector<32x128xf32>
    %67 = arith.mulf %43, %66 : vector<32x128xf32>
    %c0_8 = arith.constant 0 : index
    %c1 = arith.constant 1 : index
    %68 = arith.index_cast %40 : i32 to index
    %c0_9 = arith.constant 0 : index
    %69 = vector.load %arg5[%c0_8, %c1, %68, %c0_9] : memref<1x4x32x128xf32, #tpu.memory_space<vmem>>, vector<1x1x32x128xf32>
    %70 = vector.shape_cast %69 : vector<1x1x32x128xf32> to vector<32x128xf32>
    %71 = vector.shape_cast %67 : vector<32x128xf32> to vector<1x1x32x128xf32>
    tpu.vector_store %arg5[%c0_8, %c1, %68, %c0_9], %71 {strides = array<i32>} : memref<1x4x32x128xf32, #tpu.memory_space<vmem>>, vector<1x1x32x128xf32>,
    %72 = vector.broadcast %31 : f32 to vector<32x128xf32>
    %73 = arith.mulf %72, %4 : vector<32x128xf32>
    %74 = vector.broadcast %34 : f32 to vector<32x128xf32>
    %75 = arith.mulf %74, %47 : vector<32x128xf32>
    %76 = arith.addf %73, %75 : vector<32x128xf32>
    %77 = vector.broadcast %37 : f32 to vector<32x128xf32>
    %78 = arith.addf %76, %77 : vector<32x128xf32>
    %79 = arith.mulf %43, %78 : vector<32x128xf32>
    %c0_10 = arith.constant 0 : index
    %c2 = arith.constant 2 : index
    %80 = arith.index_cast %40 : i32 to index
    %c0_11 = arith.constant 0 : index
    %81 = vector.load %arg5[%c0_10, %c2, %80, %c0_11] : memref<1x4x32x128xf32, #tpu.memory_space<vmem>>, vector<1x1x32x128xf32>
    %82 = vector.shape_cast %81 : vector<1x1x32x128xf32> to vector<32x128xf32>
    %83 = vector.shape_cast %79 : vector<32x128xf32> to vector<1x1x32x128xf32>
    tpu.vector_store %arg5[%c0_10, %c2, %80, %c0_11], %83 {strides = array<i32>} : memref<1x4x32x128xf32, #tpu.memory_space<vmem>>, vector<1x1x32x128xf32>,
    %c0_12 = arith.constant 0 : index
    %c3 = arith.constant 3 : index
    %84 = arith.index_cast %40 : i32 to index
    %c0_13 = arith.constant 0 : index
    %85 = vector.load %arg5[%c0_12, %c3, %84, %c0_13] : memref<1x4x32x128xf32, #tpu.memory_space<vmem>>, vector<1x1x32x128xf32>
    %86 = vector.shape_cast %85 : vector<1x1x32x128xf32> to vector<32x128xf32>
    %87 = vector.shape_cast %38 : vector<32x128xf32> to vector<1x1x32x128xf32>
    tpu.vector_store %arg5[%c0_12, %c3, %84, %c0_13], %87 {strides = array<i32>} : memref<1x4x32x128xf32, #tpu.memory_space<vmem>>, vector<1x1x32x128xf32>,
    %c1_i32_14 = arith.constant 1 : i32
    return
  }
  func.func @transform_0(%arg0: i32, %arg1: i32, %arg2: i32, %arg3: memref<18xf32, #tpu.memory_space<smem>>) -> (i32, i32, i32, i32) {
    %c0_i32 = arith.constant 0 : i32
    %c0_i32_0 = arith.constant 0 : i32
    return %arg0, %c0_i32, %arg1, %arg2 : i32, i32, i32, i32
  }
  func.func @transform_1(%arg0: i32, %arg1: i32, %arg2: i32, %arg3: memref<18xf32, #tpu.memory_space<smem>>) -> (i32, i32, i32, i32) {
    %c0_i32 = arith.constant 0 : i32
    %c0_i32_0 = arith.constant 0 : i32
    return %arg0, %c0_i32, %arg1, %arg2 : i32, i32, i32, i32
  }
}

</mosaic_0001>

<bundles_post_ra>
// kernel: backproject_depth.1
= control target key start
LH: loop header
LB: loop body
LE: loop exit
PB: predicated region body
PF: predicated region fallthrough
CT: control target
= control target key end

     0   :  { %s862_s0 = inlined_call_operand.hbm [shape: f32[18], index: 0, kind: input, shape index: {}]   ;;  %s863_s1 = inlined_call_operand.hbm [shape: f32[2,1,16,16], index: 1, kind: input, shape index: {}]   ;;  %s864_s2 = inlined_call_operand.hbm [shape: f32[2,4,16,16], index: 2, kind: output, shape index: {}]  }
   0x1   :  { %s550_s11 = scalar_lea.hbm %s862_s0, 16 }
   0x2   :  { %p551_p0 = scmp.ne.s32.totalorder %s862_s0, %s550_s11  ;;  %p554_p1 = scmp.lt.u32.totalorder %s550_s11, %s862_s0 }
   0x4   :  { %p556_p2 = pnand %p554_p1, %p551_p0 }
   0x6   :  { %559 = shalt.err (!%p556_p2)  }
   0x7   :  { %s642_s16 = smov [#allocation3]  }
   0x8   :  { %8 = dma.hbm_to_smem %s862_s0, 16, %s642_s16, [#allocation2] }
   0x9   :  { %608 = dma.done.wait [#allocation2], 16 }
   0xa   :  { %609 = vsyncadd [#allocation2], 4294967280 }
   0xb   :  { %10 = sfence }
   0xc   :  { %11 = vsyncpa [#allocation5], 0 }
   0xd   :  { %13 = vsyncpa [#allocation5 + $0x1], 0 }
   0xe   :  { %14 = vsyncpa [#allocation6], 0 }
   0xf   :  { %16 = vsyncpa [#allocation6 + $0x1], 0  ;;  %s681_s19 = smov 0   ;;  %s683_s20 = smov 0  }
  0x10   :  { %s685_s21 = smov 0   ;;  %s687_s22 = smov 0  }
  0x11   :  { %s689_s23 = smov 0   ;;  %s691_s24 = smov 0  }
  0x12 LB: > { %s455_s0 = sadd.s32 4294967295, %s640_s24   ;;  %s456_s25 = sadd.s32 4294967294, %s640_s24   ;;  %s640_s24 = sphi %s691_s24, %s22_s24   ;;  %s636_s23 = sphi %s689_s23, %s875_s23   ;;  %s632_s22 = sphi %s687_s22, %s874_s22   ;;  %s628_s21 = sphi %s685_s21, %s873_s21   ;;  %s624_s20 = sphi %s683_s20, %s872_s20   ;;  %s620_s19 = sphi %s681_s19, %s871_s19  }
  0x13   : > { %s41_s26 = sadd.s32 1, %s636_s23  ;;  %s52_s27 = sadd.s32 1, %s628_s21 }
  0x14   : > { %p43_p3 = scmp.ge.s32.totalorder %s41_s26, 2  ;;  %p59_p4 = scmp.ne.s32.totalorder %s628_s21, %s624_s20 }
  0x15   : > { %p60_p5 = scmp.eq.s32.totalorder %s640_s24, 0  ;;  %p65_p6 = scmp.ne.s32.totalorder %s624_s20, %s620_s19 }
  0x16   : > { %s877_s26 = smov (%p43_p3, %s41_s26), 0  ;;  %p66_p8 = scmp.eq.s32.totalorder %s455_s0, 0 }
  0x17   : > { %p61_p7 = por %p60_p5, %p59_p4  ;;  %s45_s28 = ssub.s32 %s636_s23, %s877_s26 }
  0x18   : > { %p93_p9 = scmp.eq.s32.totalorder %s455_s0, 1  ;;  %p50_p10 = scmp.eq.s32.totalorder %s45_s28, 0 }
  0x19   : > { %p724_p11 = por %p66_p8, %p65_p6  ;;  %p99_p13 = scmp.eq.s32.totalorder %s456_s25, 1 }
  0x1a   : > { %p728_p12 = por %p93_p9, %p59_p4  ;;  %p865_p1 = scmp.ge.s32.totalorder %s640_s24, 2 }
  0x1b   : > { %s733_s3 = scalar_select %p50_p10, %s628_s21, %s52_s27  }
  0x1c   : > { %p735_p0 = por %p99_p13, %p65_p6  ;;  %115 = sbr.rel (%p865_p1) target bundleno = 66 (0x42), region = 16 }
  0x1e   : > { %s868_s4 = scalar_select %p735_p0, 1, 0 }
  0x23   : > { %118 = sbr.rel (!%p61_p7) target bundleno = 66 (0x42), region = 20  ;;  %s119_s5 = sand.u32 (%p61_p7), 1, %s628_s21  }
  0x24   : > { %s459_s6 = sshll.u32 (%p61_p7), %s119_s5, 5  ;;  %s743_s7 = scalar_lea.sflag (%p61_p7), [#allocation5], %s119_s5 }
  0x25   : > { %s123_s8 = scalar_lea.vmem (%p61_p7), [#allocation4], %s459_s6 }
  0x2a   : > { %129 = vsyncadd %s743_s7, 256  ;;  %s482_s9 = sshll.u32 %s636_s23, 8  ;;  %s137_s10 = sshll.u32 %s123_s8, 4  ;;  %s138_s10 = int_to_ptr.vmem [resolvable:$true] %s137_s10 }
  0x2b   : > { %s750_s13 = scalar_lea.hbm %s863_s1, %s482_s9  ;;  %s562_s17 = scalar_lea.hbm %s863_s1, 512 }
  0x2c   : > { %s560_s14 = scalar_lea.hbm %s750_s13, 256  ;;  %p563_p3 = scmp.lt.u32.totalorder %s750_s13, %s863_s1 }
  0x2d   : > { %p561_p2 = scmp.ne.s32.totalorder %s750_s13, %s560_s14  ;;  %p564_p4 = scmp.lt.u32.totalorder %s562_s17, %s560_s14 }
  0x2e   : > { %p566_p6 = scmp.lt.u32.totalorder %s560_s14, %s750_s13 }
  0x2f   : > { %p565_p5 = por %p564_p4, %p563_p3 }
  0x31   : > { %p567_p7 = por %p566_p6, %p565_p5 }
  0x33   : > { %p568_p8 = pnand %p567_p7, %p561_p2 }
  0x35   : > { %571 = shalt.err (!%p568_p8)
}
  0x36   : > { %s572_s25 = scalar_lea.vmem %s138_s10, 256  ;;  %s643_s27 = smov [#allocation4]  }
  0x37   : > { %p573_p9 = scmp.ne.s32.totalorder %s138_s10, %s572_s25  ;;  %s574_s28 = sshll.u32 %s643_s27, 4  ;;  %s575_s28 = int_to_ptr.vmem [resolvable:$false] %s574_s28 }
  0x38   : > { %s576_s5 = scalar_lea.vmem %s575_s28, 1024  ;;  %p577_p10 = scmp.lt.s32.totalorder %s138_s10, %s575_s28 }
  0x39   : > { %p578_p13 = scmp.lt.s32.totalorder %s576_s5, %s572_s25 }
  0x3b   : > { %p579_p1 = por %p578_p13, %p577_p10 }
  0x3d   : > { %p580_p0 = pnand %p579_p1, %p573_p9 }
  0x3f   : > { %583 = shalt.err (!%p580_p0)
}
  0x40   : > { %s644_s6 = smov 128   ;;  %s645_s8 = smov 8  }
  0x41   : > { %143 = dma.hbm_to_vmem [thread:$0]  %s750_s13, 256, %s138_s10, %s743_s7, %s644_s6, %s644_s6, %s645_s8  }
  0x42 PF: > { %p462_p2 = scmp.ge.s32.totalorder %s640_s24, 1  ;;  %p145_p3 = scmp.lt.s32.totalorder %s640_s24, 3 }
  0x44   : > { %p146_p4 = pnand %p462_p2, %p145_p3 }
  0x45   : > { %s767_s9 = sand.u32 (!%p146_p4), 1, %s624_s20  }
  0x46   : > { %149 = sbr.rel (%p146_p4) target bundleno = 118 (0x76), region = 24  ;;  %s463_s11 = sshll.u32 (!%p146_p4), %s767_s9, 5 }
  0x47   : > { %s152_s12 = scalar_lea.sflag (!%p146_p4), [#allocation5], %s767_s9  ;;  %s771_s14 = scalar_lea.vmem (!%p146_p4), [#allocation4], %s463_s11 }
  0x4d   : > { %611 = dma.done.wait (%p724_p11), %s152_s12, 512  }
  0x4e   : > { %613 = vsyncadd (%p724_p11), %s152_s12, 4294966784  ;;  %s464_s7 = sshll.u32 %s767_s9, 7  ;;  %v180_v0 = vlaneseq  ;;  %s779_s10 = smul.u32 9, %s632_s22  ;;  %v646_v3 = vmov 1.0   ;;  %v219_v21 = vld [vmem:[%s771_s14] sm:$0xff]  ;;  %v220_v26 = vld [vmem:[%s771_s14 + $0x8] sm:$0xff] }
  0x4f   : > { %s783_s16 = scalar_lea.vmem [#allocation7], %s464_s7  ;;  %v221_v27 = vld [vmem:[%s771_s14 + $0x10] sm:$0xff]  ;;  %v222_v34 = vld [vmem:[%s771_s14 + $0x18] sm:$0xff]  ;;  %s310_s14 = scalar_lea.sflag [#allocation6], %s767_s9 }
  0x50   : > { %v181_v1 = vand.u32 127, %v180_v0  ;;  %v187_v2 = vshrl.u32 %v180_v0, 7  ;;  %s202_s13 = sld [smem:[#allocation3 + %s779_s10]]  ;;  %s203_s15 = sadd.s32 1, %s779_s10  ;;  %473 = vst [vmem:[%s783_s16 + $0x60] sm:$0xff] %v646_v3  ;;  %474 = vst [vmem:[%s783_s16 + $0x68] sm:$0xff] %v646_v3 }
  0x51   : > { %475 = vst [vmem:[%s783_s16 + $0x70] sm:$0xff] %v646_v3  ;;  %476 = vst [vmem:[%s783_s16 + $0x78] sm:$0xff] %v646_v3  ;;  %s204_s29 = sld [smem:[#allocation3 + %s203_s15]]  ;;  %s205_s17 = sadd.s32 2, %s779_s10 }
  0x52   : > { %s206_s18 = sld [smem:[#allocation3 + %s205_s17]]  ;;  %v188_v4 = vadd.s32 8, %v187_v2  ;;  %v189_v5 = vadd.s32 16, %v187_v2  ;;  %s207_s0 = sadd.s32 3, %s779_s10  ;;  %v791_v6 = vcvt.s32.f32 %v181_v1  ;;  %v190_v7 = vadd.s32 24, %v187_v2 }
  0x53   : > { %s208_s25 = sld [smem:[#allocation3 + %s207_s0]]  ;;  %s209_s27 = sadd.s32 4, %s779_s10  ;;  %v197_v8 = vcvt.s32.f32 %v187_v2 }
  0x54   : > { %v198_v9 = vcvt.s32.f32 %v188_v4  ;;  %v199_v10 = vcvt.s32.f32 %v189_v5  ;;  %s210_s28 = sld [smem:[#allocation3 + %s209_s27]]  ;;  %s211_s5 = sadd.s32 5, %s779_s10  ;;  %v795_v11 = vcvt.s32.f32 %v190_v7 }
  0x55   : > { %s212_s6 = sld [smem:[#allocation3 + %s211_s5]]  ;;  %s213_s8 = sadd.s32 6, %s779_s10 }
  0x56   : > { %v227_v12 = vstv %s202_s13  ;;  %s215_s11 = sadd.s32 7, %s779_s10  ;;  %s800_s12 = sld [smem:[#allocation3 + %s213_s8]] }
  0x57   : > { %v228_v13 = vmul.f32 %v227_v12, %v791_v6  ;;  %v229_v14 = vstv %s204_s29  ;;  %s217_s7 = sadd.s32 8, %s779_s10  ;;  %s803_s15 = sld [smem:[#allocation3 + %s215_s11]] }
  0x58   : > { %v230_v15 = vmul.f32 %v229_v14, %v197_v8  ;;  %v231_v16 = vmul.f32 %v229_v14, %v198_v9  ;;  %v232_v17 = vmul.f32 %v229_v14, %v199_v10  ;;  %s805_s17 = sld [smem:[#allocation3 + %s217_s7]]  ;;  %v238_v18 = vstv %s206_s18 }
  0x59   : > { %v233_v19 = vmul.f32 %v229_v14, %v795_v11  ;;  %v251_v20 = vstv %s208_s25 }
  0x5a   : > { %v234_v22 = vadd.f32 %v230_v15, %v228_v13  ;;  %v235_v23 = vadd.f32 %v231_v16, %v228_v13  ;;  %v236_v24 = vadd.f32 %v232_v17, %v228_v13  ;;  %v252_v25 = vmul.f32 %v251_v20, %v791_v6 }
  0x5b   : > { %v237_v28 = vadd.f32 %v233_v19, %v228_v13  ;;  %v253_v29 = vstv %s210_s28  ;;  %v262_v30 = vstv %s212_s6 }
  0x5c   : > { %v239_v31 = vadd.f32 %v238_v18, %v234_v22  ;;  %v240_v32 = vadd.f32 %v238_v18, %v235_v23  ;;  %v241_v33 = vadd.f32 %v238_v18, %v236_v24  ;;  %v254_v35 = vmul.f32 %v253_v29, %v197_v8 }
  0x5d   : > { %v242_v36 = vadd.f32 %v238_v18, %v237_v28  ;;  %v255_v37 = vmul.f32 %v253_v29, %v198_v9  ;;  %v256_v38 = vmul.f32 %v253_v29, %v199_v10  ;;  %v257_v39 = vmul.f32 %v253_v29, %v795_v11 }
  0x5e   : > { %v243_v40 = vmul.f32 %v239_v31, %v219_v21  ;;  %v244_v41 = vmul.f32 %v240_v32, %v220_v26  ;;  %v245_v42 = vmul.f32 %v241_v33, %v221_v27  ;;  %v258_v43 = vadd.f32 %v254_v35, %v252_v25 }
  0x5f   : > { %v246_v44 = vmul.f32 %v242_v36, %v222_v34  ;;  %v259_v45 = vadd.f32 %v255_v37, %v252_v25  ;;  %v260_v46 = vadd.f32 %v256_v38, %v252_v25  ;;  %v261_v47 = vadd.f32 %v257_v39, %v252_v25 }
  0x60   : > { %247 = vst [vmem:[%s783_s16] sm:$0xff] %v243_v40  ;;  %248 = vst [vmem:[%s783_s16 + $0x8] sm:$0xff] %v244_v41  ;;  %v263_v48 = vadd.f32 %v262_v30, %v258_v43  ;;  %v277_v49 = vstv %s800_s12  ;;  %v279_v50 = vstv %s803_s15 }
  0x61   : > { %249 = vst [vmem:[%s783_s16 + $0x10] sm:$0xff] %v245_v42  ;;  %v288_v51 = vstv %s805_s17  ;;  %250 = vst [vmem:[%s783_s16 + $0x18] sm:$0xff] %v246_v44  ;;  %v264_v52 = vadd.f32 %v262_v30, %v259_v45  ;;  %v265_v53 = vadd.f32 %v262_v30, %v260_v46  ;;  %v266_v54 = vadd.f32 %v262_v30, %v261_v47 }
  0x62   : > { %v278_v55 = vmul.f32 %v277_v49, %v791_v6  ;;  %v267_v56 = vmul.f32 %v263_v48, %v219_v21  ;;  %v280_v57 = vmul.f32 %v279_v50, %v197_v8  ;;  %v281_v58 = vmul.f32 %v279_v50, %v198_v9 }
  0x63   : > { %v282_v59 = vmul.f32 %v279_v50, %v199_v10  ;;  %v268_v60 = vmul.f32 %v264_v52, %v220_v26  ;;  %v269_v61 = vmul.f32 %v265_v53, %v221_v27  ;;  %v270_v62 = vmul.f32 %v266_v54, %v222_v34 }
  0x64   : > { %v283_v63 = vmul.f32 %v279_v50, %v795_v11  ;;  %465 = vst [vmem:[%s783_s16 + $0x20] sm:$0xff] %v267_v56  ;;  %v284_v0 = vadd.f32 %v280_v57, %v278_v55  ;;  %v285_v1 = vadd.f32 %v281_v58, %v278_v55 }
  0x65   : > { %v286_v2 = vadd.f32 %v282_v59, %v278_v55  ;;  %466 = vst [vmem:[%s783_s16 + $0x28] sm:$0xff] %v268_v60  ;;  %467 = vst [vmem:[%s783_s16 + $0x30] sm:$0xff] %v269_v61 }
  0x66   : > { %468 = vst [vmem:[%s783_s16 + $0x38] sm:$0xff] %v270_v62  ;;  %v287_v3 = vadd.f32 %v283_v63, %v278_v55  ;;  %v289_v4 = vadd.f32 %v288_v51, %v284_v0  ;;  %v290_v5 = vadd.f32 %v288_v51, %v285_v1  ;;  %316 = sbr.rel (!%p728_p12) target bundleno = 118 (0x76), region = 32 }
  0x67   : > { %v291_v6 = vadd.f32 %v288_v51, %v286_v2 }
  0x68   : > { %v292_v7 = vadd.f32 %v288_v51, %v287_v3  ;;  %v293_v8 = vmul.f32 %v289_v4, %v219_v21  ;;  %v294_v9 = vmul.f32 %v290_v5, %v220_v26 }
  0x69   : > { %v295_v10 = vmul.f32 %v291_v6, %v221_v27 }
  0x6a   : > { %v296_v11 = vmul.f32 %v292_v7, %v222_v34  ;;  %469 = vst [vmem:[%s783_s16 + $0x40] sm:$0xff] %v293_v8  ;;  %470 = vst [vmem:[%s783_s16 + $0x48] sm:$0xff] %v294_v9 }
  0x6b   : > { %471 = vst [vmem:[%s783_s16 + $0x50] sm:$0xff] %v295_v10 }
  0x6c   : > { %472 = vst [vmem:[%s783_s16 + $0x58] sm:$0xff] %v296_v11 }
  0x6d   : > { %322 = vsyncadd %s310_s14, 1024  ;;  %s483_s10 = sshll.u32 %s632_s22, 10  ;;  %s347_s13 = sshll.u32 %s783_s16, 4  ;;  %s348_s13 = int_to_ptr.vmem [resolvable:$true] %s347_s13 }
  0x6e   : > { %s328_s0 = scalar_lea.hbm %s864_s2, %s483_s10  ;;  %s647_s25 = smov 512  }
  0x6f   : > { %354 = sst [smem:[#allocation9]] %s647_s25  ;;  %s648_s27 = smov 256  }
  0x70   : > { %356 = sst [smem:[#allocation9 + $0x1]] %s648_s27  ;;  %s649_s28 = smov 2  }
  0x71   : > { %358 = sst [smem:[#allocation9 + $0x2]] %s649_s28  ;;  %s650_s9 = smov 128  }
  0x72   : > { %360 = sst [smem:[#allocation9 + $0x3]] %s650_s9  ;;  %s651_s30 = smov 8  }
  0x73   : > { %362 = sst [smem:[#allocation9 + $0x4]] %s650_s9  ;;  %s652_s5 = smov [#allocation8]  }
  0x74   : > { %364 = sst [smem:[#allocation9 + $0x5]] %s651_s30  ;;  %s653_s6 = smov 0  }
  0x75   : > { %366 = dma.general %s348_s13, 1024, %s328_s0, %s310_s14, %s652_s5, [#allocation9], %s653_s6, 0  }
  0x76 PF: > { %s375_s22 = sand.u32 1, %s620_s19   ;;  %p869_p11 = scmp.ne.s32.totalorder %s868_s4, 0 }
  0x77   : > { %p870_p12 = scmp.ge.s32.totalorder %s640_s24, 2  ;;  %s376_s16 = scalar_lea.sflag [#allocation6], %s375_s22 }
  0x79   : > { %p487_p0 = pnand %p870_p12, %p869_p11 }
  0x7b   : > { %615 = dma.done.wait (!%p487_p0), %s376_s16, 2048  }
  0x7c   : > { %617 = vsyncadd (!%p487_p0), %s376_s16, 4294965248  ;;  %s22_s24 = sadd.s32 1, %s640_s24   ;;  %s871_s19 = smov %s624_s20 }
  0x7d   : > { %p19_p1 = scmp.ge.s32.totalorder %s22_s24, 4   ;;  %s872_s20 = smov %s628_s21 }
  0x7e   : > { %s873_s21 = smov %s733_s3  ;;  %s874_s22 = smov %s636_s23 }
  0x7f   : > { %s875_s23 = smov %s877_s26  ;;  %21 = sbr.rel (!%p19_p1) target bundleno = 18 (0x12), region = 77 }
  0x86   :  { %381 = vsyncpa [#allocation5], 1 }
  0x87   :  { %383 = vsyncpa [#allocation5 + $0x1], 1 }
  0x88   :  { %384 = vsyncpa [#allocation6], 1 }
  0x89   :  { %386 = vsyncpa [#allocation6 + $0x1], 1 }

</bundles_post_ra>
